<compile_context>
chip_gen: v7x
topology: tpu7x:2x2x1
jax: 0.10.0
libtpu: 0.0.40
codegen_flags: <defaults>
</compile_context>

<pallas_src>
import jax
import jax.numpy as jnp
from jax.experimental import pallas as pl
from jax.experimental.pallas import tpu as pltpu


def _round_up(n, m):
    return ((n + m - 1) // m) * m


# ----------------------------------------------------------------------------
# Fused Linear kernel:  out = x @ w + b   (bf16 stream, f32 accumulate/out)
# ----------------------------------------------------------------------------
def _linear_kernel(x_ref, w_ref, b_ref, o_ref):
    k = pl.program_id(2)

    @pl.when(k == 0)
    def _():
        o_ref[...] = jnp.zeros_like(o_ref)

    # Accumulate directly into the (k-invariant, VMEM-resident) f32 output.
    o_ref[...] += jnp.dot(x_ref[...], w_ref[...],
                          preferred_element_type=jnp.float32)

    @pl.when(k == pl.num_programs(2) - 1)
    def _():
        o_ref[...] = o_ref[...] + b_ref[...]


def linear_bias(x, w, b, *, compute_dtype=jnp.bfloat16):
    """x: (M, K) f32, w: (K, N) f32, b: (N,) f32 -> (M, N) f32."""
    M, K = x.shape
    K2, N = w.shape
    assert K == K2 and b.shape == (N,)

    # Sublane multiple for the streaming dtype (bf16 packs 16 rows per vreg).
    sub = 16 if compute_dtype == jnp.bfloat16 else 8
    TM = min(256, _round_up(M, sub))      # tiny-batch friendly: no 128-padding
    TN = min(256, _round_up(N, 128))      # lane-dense output tiles
    TK = min(1024, _round_up(K, 128))     # large reduction tiles -> fewer steps

    Mp, Kp, Np = _round_up(M, TM), _round_up(K, TK), _round_up(N, TN)

    x_p = jnp.pad(x.astype(compute_dtype), ((0, Mp - M), (0, Kp - K)))
    w_p = jnp.pad(w.astype(compute_dtype), ((0, Kp - K), (0, Np - N)))
    b_p = jnp.pad(b.astype(jnp.float32).reshape(1, N), ((0, 0), (0, Np - N)))

    grid = (Mp // TM, Np // TN, Kp // TK)   # reduction axis (k) last

    out = pl.pallas_call(
        _linear_kernel,
        out_shape=jax.ShapeDtypeStruct((Mp, Np), jnp.float32),
        grid_spec=pltpu.PrefetchScalarGridSpec(
            num_scalar_prefetch=0,
            grid=grid,
            in_specs=[
                pl.BlockSpec((TM, TK), lambda i, j, k: (i, k)),
                pl.BlockSpec((TK, TN), lambda i, j, k: (k, j)),
                pl.BlockSpec((1, TN), lambda i, j, k: (0, j)),
            ],
            out_specs=pl.BlockSpec((TM, TN), lambda i, j, k: (i, j)),
        ),
        compiler_params=pltpu.CompilerParams(
            dimension_semantics=("parallel", "parallel", "arbitrary")),
    )(x_p, w_p, b_p)
    return out[:M, :N]


# ----------------------------------------------------------------------------
# Parameters (deterministic, nn.Linear-style uniform init)
# ----------------------------------------------------------------------------
def init_params(key, inc=4096, num_class=64):
    k_w, k_b = jax.random.split(key)
    bound = 1.0 / (inc ** 0.5)
    # PyTorch weight is (num_class, inc); stored here pre-transposed to
    # (inc, num_class) so the kernel computes x @ w directly.
    w = jax.random.uniform(k_w, (inc, num_class), jnp.float32, -bound, bound)
    b = jax.random.uniform(k_b, (num_class,), jnp.float32, -bound, bound)
    return {"w": w, "b": b}


# ----------------------------------------------------------------------------
# Predictor_nograd.forward
# ----------------------------------------------------------------------------
def predictor_nograd_forward(params, x):
    # ZeroLayerF.apply(x, 0.0) is identity in the forward pass (only the
    # backward gradient is zeroed), so it is a no-op here.
    # TODO(synk): multi_fc=True branch (Linear->BatchNorm1d->ReLU->Linear) not
    # implemented; the module's default constructor (multi_fc=False) uses a
    # single Linear, which is what this kernel computes.
    return linear_bias(x, params["w"], params["b"])


if __name__ == "__main__":
    key = jax.random.PRNGKey(0)
    k_param, k_x = jax.random.split(key)

    batch, inc, num_class = 2, 4096, 64
    params = init_params(k_param, inc=inc, num_class=num_class)
    x = jax.random.normal(k_x, (batch, inc), jnp.float32)

    fwd = jax.jit(predictor_nograd_forward)
    out = jax.block_until_ready(fwd(params, x))

    assert out.shape == (batch, num_class), out.shape
    assert bool(jnp.all(jnp.isfinite(out)))

    # Tolerance check vs. a plain-JAX f32 reference (bf16 streaming inside).
    ref = x @ params["w"] + params["b"]
    assert bool(jnp.allclose(out, ref, atol=5e-2, rtol=5e-2)), float(
        jnp.max(jnp.abs(out - ref)))

    print("KERNEL_OK")
</pallas_src>

<mosaic_0001>
module attributes {stable_mosaic.version = 11 : i64} {
  func.func @_linear_kernel(%arg0: i32, %arg1: i32, %arg2: i32, %arg3: memref<16x1024xbf16, #tpu.memory_space<vmem>>, %arg4: memref<1024x128xbf16, #tpu.memory_space<vmem>>, %arg5: memref<1x128xf32, #tpu.memory_space<vmem>>, %arg6: memref<16x128xf32, #tpu.memory_space<vmem>>) attributes {dimension_semantics = [#tpu.dimension_semantics<parallel>, #tpu.dimension_semantics<parallel>, #tpu.dimension_semantics<arbitrary>], iteration_bounds = array<i64: 1, 1, 4>, scalar_prefetch = 0 : i64, scratch_operands = 0 : i64, tpu.core_type = #tpu.core_type<tc>, window_params = [{transform_indices = @transform_0, window_bounds = array<i64: 16, 1024>}, {transform_indices = @transform_1, window_bounds = array<i64: 1024, 128>}, {transform_indices = @transform_2, window_bounds = array<i64: 1, 128>}, {transform_indices = @transform_3, window_bounds = array<i64: 16, 128>}]} {
    %c0_i32 = arith.constant 0 : i32
    %0 = arith.cmpi eq, %arg2, %c0_i32 : i32
    %1 = arith.extui %0 : i1 to i32
    %c0_i32_0 = arith.constant 0 : i32
    %2 = arith.cmpi ne, %1, %c0_i32_0 : i32
    scf.if %2 {
      %cst_9 = arith.constant 0.000000e+00 : f32
      %12 = vector.broadcast %cst_9 : f32 to vector<16x128xf32>
      %c0_10 = arith.constant 0 : index
      %c0_11 = arith.constant 0 : index
      %13 = vector.load %arg6[%c0_10, %c0_11] : memref<16x128xf32, #tpu.memory_space<vmem>>, vector<16x128xf32>
      tpu.vector_store %arg6[%c0_10, %c0_11], %12 {strides = array<i32>} : memref<16x128xf32, #tpu.memory_space<vmem>>, vector<16x128xf32>,
    } else {
    }
    %c0 = arith.constant 0 : index
    %c0_1 = arith.constant 0 : index
    %3 = vector.load %arg6[%c0, %c0_1] : memref<16x128xf32, #tpu.memory_space<vmem>>, vector<16x128xf32>
    %c0_2 = arith.constant 0 : index
    %c0_3 = arith.constant 0 : index
    %4 = vector.load %arg3[%c0_2, %c0_3] : memref<16x1024xbf16, #tpu.memory_space<vmem>>, vector<16x1024xbf16>
    %c0_4 = arith.constant 0 : index
    %c0_5 = arith.constant 0 : index
    %5 = vector.load %arg4[%c0_4, %c0_5] : memref<1024x128xbf16, #tpu.memory_space<vmem>>, vector<1024x128xbf16>
    %cst = arith.constant dense<0.000000e+00> : vector<16x128xf32>
    %6 = tpu.matmul %4, %5, %cst {dimension_numbers = #tpu.dot_dimension_numbers<[1], [0], [0], [1], [0, 0, 1, 1], [], []>} : vector<16x1024xbf16>, vector<1024x128xbf16>, vector<16x128xf32> -> vector<16x128xf32>
    %7 = arith.addf %3, %6 : vector<16x128xf32>
    %c0_6 = arith.constant 0 : index
    %c0_7 = arith.constant 0 : index
    %8 = vector.load %arg6[%c0_6, %c0_7] : memref<16x128xf32, #tpu.memory_space<vmem>>, vector<16x128xf32>
    tpu.vector_store %arg6[%c0_6, %c0_7], %7 {strides = array<i32>} : memref<16x128xf32, #tpu.memory_space<vmem>>, vector<16x128xf32>,
    %c3_i32 = arith.constant 3 : i32
    %9 = arith.cmpi eq, %arg2, %c3_i32 : i32
    %10 = arith.extui %9 : i1 to i32
    %c0_i32_8 = arith.constant 0 : i32
    %11 = arith.cmpi ne, %10, %c0_i32_8 : i32
    scf.if %11 {
      %c0_9 = arith.constant 0 : index
      %c0_10 = arith.constant 0 : index
      %12 = vector.load %arg6[%c0_9, %c0_10] : memref<16x128xf32, #tpu.memory_space<vmem>>, vector<16x128xf32>
      %c0_11 = arith.constant 0 : index
      %c0_12 = arith.constant 0 : index
      %13 = vector.load %arg5[%c0_11, %c0_12] : memref<1x128xf32, #tpu.memory_space<vmem>>, vector<1x128xf32>
      %14 = vector.broadcast %13 : vector<1x128xf32> to vector<16x128xf32>
      %15 = arith.addf %12, %14 : vector<16x128xf32>
      %c0_13 = arith.constant 0 : index
      %c0_14 = arith.constant 0 : index
      %16 = vector.load %arg6[%c0_13, %c0_14] : memref<16x128xf32, #tpu.memory_space<vmem>>, vector<16x128xf32>
      tpu.vector_store %arg6[%c0_13, %c0_14], %15 {strides = array<i32>} : memref<16x128xf32, #tpu.memory_space<vmem>>, vector<16x128xf32>,
    } else {
    }
    return
  }
  func.func @transform_0(%arg0: i32, %arg1: i32, %arg2: i32) -> (i32, i32) {
    %c0_i32 = arith.constant 0 : i32
    return %arg0, %arg2 : i32, i32
  }
  func.func @transform_1(%arg0: i32, %arg1: i32, %arg2: i32) -> (i32, i32) {
    %c0_i32 = arith.constant 0 : i32
    return %arg2, %arg1 : i32, i32
  }
  func.func @transform_2(%arg0: i32, %arg1: i32, %arg2: i32) -> (i32, i32) {
    %c0_i32 = arith.constant 0 : i32
    %c0_i32_0 = arith.constant 0 : i32
    return %c0_i32, %arg1 : i32, i32
  }
  func.func @transform_3(%arg0: i32, %arg1: i32, %arg2: i32) -> (i32, i32) {
    %c0_i32 = arith.constant 0 : i32
    return %arg0, %arg1 : i32, i32
  }
}

</mosaic_0001>

<bundles_post_ra>
// kernel: predictor_nograd_forward.1
= control target key start
LH: loop header
LB: loop body
LE: loop exit
PB: predicated region body
PF: predicated region fallthrough
CT: control target
= control target key end

     0   :  { %s1497_s12 = smov 0   ;;  %s1499_s13 = smov 0   ;;  %s1673_s0 = inlined_call_operand.vmem [shape: bf16[16,4096], index: 0, kind: input, shape index: {}]   ;;  %s1674_s1 = inlined_call_operand.vmem [shape: bf16[4096,128], index: 1, kind: input, shape index: {}]   ;;  %s1675_s2 = inlined_call_operand.vmem [shape: f32[1,128], index: 2, kind: input, shape index: {}]   ;;  %s1676_s3 = inlined_call_operand.vmem [shape: f32[16,128], index: 3, kind: output, shape index: {}]  }
   0x1   :  { %s1501_s14 = smov 0   ;;  %s1503_s15 = smov 0  }
   0x2   :  { %s1505_s16 = smov 0  }
   0x3 LB: > { %s25_s17 = sadd.s32 1, %s1470_s15  ;;  %p48_p1 = scmp.ne.s32.totalorder %s1462_s13, %s1458_s12  ;;  %s1474_s16 = sphi %s1505_s16, %s13_s16   ;;  %s1470_s15 = sphi %s1503_s15, %s1680_s15   ;;  %s1466_s14 = sphi %s1501_s14, %s1679_s14   ;;  %s1462_s13 = sphi %s1499_s13, %s1678_s13   ;;  %s1458_s12 = sphi %s1497_s12, %s1677_s12  }
   0x4   : > { %p26_p0 = scmp.ge.s32.totalorder %s25_s17, 4  ;;  %p49_p2 = scmp.eq.s32.totalorder %s1474_s16, 0 }
   0x5   : > { %s41_s19 = sadd.s32 1, %s1462_s13  ;;  %p1155_p5 = scmp.ge.s32.totalorder %s1474_s16, 4 }
   0x6   : > { %s1682_s17 = smov (%p26_p0, %s25_s17), 0  ;;  %p50_p3 = por %p49_p2, %p48_p1 }
   0x7   : > { %s37_s18 = ssub.s32 %s1470_s15, %s1682_s17  ;;  %162 = sbr.rel (%p1155_p5) target bundleno = 22 (0x16), region = 20 }
   0x8   : > { %p39_p4 = scmp.eq.s32.totalorder %s37_s18, 0 }
   0xa   : > { %s1532_s20 = scalar_select %p39_p4, %s1462_s13, %s41_s19  }
   0xe   : > { %165 = sbr.rel (!%p50_p3) target bundleno = 22 (0x16), region = 24  ;;  %s167_s21 = sand.u32 (%p50_p3), 1, %s1462_s13  }
   0xf   : > { %s1242_s22 = sshll.u32 (%p50_p3), %s1470_s15, 5  ;;  %s1156_s23 = sshll.u32 (%p50_p3), %s167_s21, 6 }
  0x10   : > { %s175_s26 = scalar_lea.vmem (%p50_p3), %s1673_s0, %s1242_s22  ;;  %s169_s27 = scalar_lea.vmem (%p50_p3), [#allocation2], %s1156_s23 }
  0x11   : > { %v188_v0 = vld [vmem:[%s175_s26] sm:$0xff] (%p50_p3)  ;;  %v190_v1 = vld [vmem:[%s175_s26 + $0x8] sm:$0xff] (%p50_p3)  ;;  %v192_v2 = vld [vmem:[%s175_s26 + $0x10] sm:$0xff] (%p50_p3) }
  0x12   : > { %189 = vst [vmem:[%s169_s27] sm:$0xff] (%p50_p3), %v188_v0  ;;  %191 = vst [vmem:[%s169_s27 + $0x8] sm:$0xff] (%p50_p3), %v190_v1  ;;  %v194_v3 = vld [vmem:[%s175_s26 + $0x18] sm:$0xff] (%p50_p3)  ;;  %v196_v4 = vld [vmem:[%s175_s26 + $0x80] sm:$0xff] (%p50_p3) }
  0x13   : > { %193 = vst [vmem:[%s169_s27 + $0x10] sm:$0xff] (%p50_p3), %v192_v2  ;;  %v198_v5 = vld [vmem:[%s175_s26 + $0x88] sm:$0xff] (%p50_p3)  ;;  %195 = vst [vmem:[%s169_s27 + $0x18] sm:$0xff] (%p50_p3), %v194_v3  ;;  %v200_v6 = vld [vmem:[%s175_s26 + $0x90] sm:$0xff] (%p50_p3) }
  0x14   : > { %197 = vst [vmem:[%s169_s27 + $0x20] sm:$0xff] (%p50_p3), %v196_v4  ;;  %199 = vst [vmem:[%s169_s27 + $0x28] sm:$0xff] (%p50_p3), %v198_v5  ;;  %v202_v7 = vld [vmem:[%s175_s26 + $0x98] sm:$0xff] (%p50_p3) }
  0x15   : > { %201 = vst [vmem:[%s169_s27 + $0x30] sm:$0xff] %v200_v6  ;;  %203 = vst [vmem:[%s169_s27 + $0x38] sm:$0xff] %v202_v7 }
  0x16 PF: > { %p1159_p6 = scmp.ge.s32.totalorder %s1474_s16, 1  ;;  %p220_p7 = scmp.lt.s32.totalorder %s1474_s16, 5 }
  0x18   : > { %p221_p8 = pnand %p1159_p6, %p220_p7 }
  0x19   : > { %s227_s28 = sand.u32 (!%p221_p8), 1, %s1458_s12   ;;  %s1161_s29 = sshll.u32 (!%p221_p8), %s1466_s14, 7 }
  0x1a   : > { %224 = sbr.rel (%p221_p8) target bundleno = 340 (0x154), region = 51  ;;  %s1160_s30 = sshll.u32 (!%p221_p8), %s227_s28, 6 }
  0x1b   : > { %p267_p9 = scmp.lt.s32.totalorder (!%p221_p8), %s1161_s29, 511  ;;  %s1549_s8 = scalar_lea.vmem (!%p221_p8), [#allocation2], %s1160_s30 }
  0x1c   : > { %p1163_p10 = scmp.ne.s32.totalorder (!%p221_p8), %s1466_s14, 0 }
  0x21   : > { %s1684_s29 = smov (!%p267_p9, %s1161_s29), 511  ;;  %291 = sbr.rel (%p1163_p10) target bundleno = 40 (0x28), region = 59 }
  0x22   : > { %s1162_s4 = sshll.u32 %s1684_s29, 2  ;;  %v1476_v8 = vmov (!%p1163_p10), 0.0  }
  0x23   : > { %s1547_s7 = scalar_lea.vmem %s1674_s1, %s1162_s4  ;;  %292 = vst [vmem:[%s1676_s3] sm:$0xff] (!%p1163_p10), %v1476_v8  ;;  %293 = vst [vmem:[%s1676_s3 + $0x8] sm:$0xff] (!%p1163_p10), %v1476_v8 }
  0x28 PF: > { %v1372_v9 = vld [vmem:[%s1547_s7 + $0x40] sm:$0xff]   ;;  %v1376_v13 = vld [vmem:[%s1547_s7 + $0x48] sm:$0xff]   ;;  %v1380_v17 = vld [vmem:[%s1547_s7 + $0x50] sm:$0xff]   ;;  %p1236_p11 = scmp.ne.s32.totalorder %s1466_s14, 3 }
  0x29   : > { %v1373_v10 = vld [vmem:[%s1547_s7 + $0xc0] sm:$0xff]   ;;  %1243 = vmatprep.subr.bf16.mxu0 %v1372_v9  ;;  %v1377_v14 = vld [vmem:[%s1547_s7 + $0xc8] sm:$0xff]   ;;  %v1381_v18 = vld [vmem:[%s1547_s7 + $0xd0] sm:$0xff]  }
  0x2a   : > { %v1374_v11 = vld [vmem:[%s1547_s7] sm:$0xff]   ;;  %1265 = vmatprep.subr.bf16.mxu1 %v1373_v10  ;;  %v1378_v15 = vld [vmem:[%s1547_s7 + $0x8] sm:$0xff]   ;;  %v1382_v19 = vld [vmem:[%s1547_s7 + $0x10] sm:$0xff]  }
  0x2b   : > { %v1375_v12 = vld [vmem:[%s1547_s7 + $0x80] sm:$0xff]   ;;  %1244 = vmatpush3.bf16.msra.mxu0 %v1374_v11  ;;  %v1379_v16 = vld [vmem:[%s1547_s7 + $0x88] sm:$0xff]   ;;  %v1383_v20 = vld [vmem:[%s1547_s7 + $0x90] sm:$0xff]  }
  0x2c   : > { %1266 = vmatpush3.bf16.msra.mxu1 %v1375_v12  ;;  %1245 = vmatprep.subr.bf16.mxu0 %v1376_v13  ;;  %v1384_v21 = vld [vmem:[%s1547_s7 + $0x58] sm:$0xff]   ;;  %v1388_v25 = vld [vmem:[%s1547_s7 + $0x60] sm:$0xff]   ;;  %v1392_v29 = vld [vmem:[%s1547_s7 + $0x68] sm:$0xff]  }
  0x2d   : > { %1267 = vmatprep.subr.bf16.mxu1 %v1377_v14  ;;  %v1385_v22 = vld [vmem:[%s1547_s7 + $0xd8] sm:$0xff]   ;;  %v1389_v26 = vld [vmem:[%s1547_s7 + $0xe0] sm:$0xff]   ;;  %v1393_v30 = vld [vmem:[%s1547_s7 + $0xe8] sm:$0xff]  }
  0x2e   : > { %v1386_v23 = vld [vmem:[%s1547_s7 + $0x18] sm:$0xff]   ;;  %v1390_v27 = vld [vmem:[%s1547_s7 + $0x20] sm:$0xff]   ;;  %v1394_v31 = vld [vmem:[%s1547_s7 + $0x28] sm:$0xff]  }
  0x2f   : > { %1246 = vmatpush3.bf16.msra.mxu0 %v1378_v15  ;;  %v1387_v24 = vld [vmem:[%s1547_s7 + $0x98] sm:$0xff]   ;;  %v1391_v28 = vld [vmem:[%s1547_s7 + $0xa0] sm:$0xff]   ;;  %v1395_v32 = vld [vmem:[%s1547_s7 + $0xa8] sm:$0xff]  }
  0x30   : > { %1268 = vmatpush3.bf16.msra.mxu1 %v1379_v16  ;;  %1247 = vmatprep.subr.bf16.mxu0 %v1380_v17  ;;  %v1396_v33 = vld [vmem:[%s1547_s7 + $0x70] sm:$0xff]   ;;  %v1400_v37 = vld [vmem:[%s1547_s7 + $0x78] sm:$0xff]   ;;  %v296_v41 = vld [vmem:[%s1549_s8] sm:$0xff] }
  0x31   : > { %1269 = vmatprep.subr.bf16.mxu1 %v1381_v18  ;;  %v1397_v34 = vld [vmem:[%s1547_s7 + $0xf0] sm:$0xff]   ;;  %v1401_v38 = vld [vmem:[%s1547_s7 + $0xf8] sm:$0xff]   ;;  %v300_v42 = vld [vmem:[%s1549_s8 + $0x20] sm:$0xff] }
  0x32   : > { %v1398_v35 = vld [vmem:[%s1547_s7 + $0x30] sm:$0xff]   ;;  %v1402_v39 = vld [vmem:[%s1547_s7 + $0x38] sm:$0xff]   ;;  %v297_v43 = vld [vmem:[%s1549_s8 + $0x8] sm:$0xff]  ;;  %v1164_v44 = vcombine.low %v296_v41, %v300_v42  ;;  %v1165_v45 = vcombine.high %v296_v41, %v300_v42 }
  0x33   : > { %1248 = vmatpush3.bf16.msra.mxu0 %v1382_v19  ;;  %v1399_v36 = vld [vmem:[%s1547_s7 + $0xb0] sm:$0xff]   ;;  %v1403_v40 = vld [vmem:[%s1547_s7 + $0xb8] sm:$0xff]   ;;  %v301_v46 = vld [vmem:[%s1549_s8 + $0x28] sm:$0xff] }
  0x34   : > { %1270 = vmatpush3.bf16.msra.mxu1 %v1383_v20  ;;  %1249 = vmatprep.subr.bf16.mxu0 %v1384_v21  ;;  %v1166_v47 = vcombine.low %v297_v43, %v301_v46  ;;  %v1167_v48 = vcombine.high %v297_v43, %v301_v46  ;;  %v1404_v49 = vld [vmem:[%s1547_s7 + $0x140] sm:$0xff]   ;;  %v1408_v53 = vld [vmem:[%s1547_s7 + $0x148] sm:$0xff]   ;;  %v1412_v57 = vld [vmem:[%s1547_s7 + $0x150] sm:$0xff]  }
  0x35   : > { %1271 = vmatprep.subr.bf16.mxu1 %v1385_v22  ;;  %888 = vmatprep.mubr.bf16.mxu0 %v1165_v45  ;;  %v1405_v50 = vld [vmem:[%s1547_s7 + $0x1c0] sm:$0xff]   ;;  %v1409_v54 = vld [vmem:[%s1547_s7 + $0x1c8] sm:$0xff]   ;;  %v1413_v58 = vld [vmem:[%s1547_s7 + $0x1d0] sm:$0xff]  }
  0x36   : > { %929 = vmatprep.mubr.bf16.mxu1 %v1167_v48  ;;  %v1406_v51 = vld [vmem:[%s1547_s7 + $0x100] sm:$0xff]   ;;  %v1410_v55 = vld [vmem:[%s1547_s7 + $0x108] sm:$0xff]   ;;  %v1414_v59 = vld [vmem:[%s1547_s7 + $0x110] sm:$0xff]  }
  0x37   : > { %1250 = vmatpush3.bf16.msra.mxu0 %v1386_v23  ;;  %v1407_v52 = vld [vmem:[%s1547_s7 + $0x180] sm:$0xff]   ;;  %v1411_v56 = vld [vmem:[%s1547_s7 + $0x188] sm:$0xff]   ;;  %v1415_v60 = vld [vmem:[%s1547_s7 + $0x190] sm:$0xff]  }
  0x38   : > { %1272 = vmatpush3.bf16.msra.mxu1 %v1387_v24  ;;  %1251 = vmatprep.subr.bf16.mxu0 %v1388_v25  ;;  %v1416_v61 = vld [vmem:[%s1547_s7 + $0x158] sm:$0xff]   ;;  %v1420_v1 = vld [vmem:[%s1547_s7 + $0x160] sm:$0xff]   ;;  %v1424_v5 = vld [vmem:[%s1547_s7 + $0x168] sm:$0xff]  }
  0x39   : > { %1273 = vmatprep.subr.bf16.mxu1 %v1389_v26  ;;  %v1417_v62 = vld [vmem:[%s1547_s7 + $0x1d8] sm:$0xff]   ;;  %v1421_v2 = vld [vmem:[%s1547_s7 + $0x1e0] sm:$0xff]   ;;  %v1425_v6 = vld [vmem:[%s1547_s7 + $0x1e8] sm:$0xff]  }
  0x3a   : > { %v1418_v63 = vld [vmem:[%s1547_s7 + $0x118] sm:$0xff]   ;;  %v1422_v3 = vld [vmem:[%s1547_s7 + $0x120] sm:$0xff]   ;;  %v1426_v7 = vld [vmem:[%s1547_s7 + $0x128] sm:$0xff]  }
  0x3b   : > { %1252 = vmatpush3.bf16.msra.mxu0 %v1390_v27  ;;  %v1419_v0 = vld [vmem:[%s1547_s7 + $0x198] sm:$0xff]   ;;  %v1423_v4 = vld [vmem:[%s1547_s7 + $0x1a0] sm:$0xff]   ;;  %v1427_v8 = vld [vmem:[%s1547_s7 + $0x1a8] sm:$0xff]  }
  0x3c   : > { %1274 = vmatpush3.bf16.msra.mxu1 %v1391_v28  ;;  %1253 = vmatprep.subr.bf16.mxu0 %v1392_v29  ;;  %v1428_v9 = vld [vmem:[%s1547_s7 + $0x170] sm:$0xff]   ;;  %v1432_v13 = vld [vmem:[%s1547_s7 + $0x178] sm:$0xff]  }
  0x3d   : > { %1275 = vmatprep.subr.bf16.mxu1 %v1393_v30  ;;  %v1429_v10 = vld [vmem:[%s1547_s7 + $0x1f0] sm:$0xff]   ;;  %v1433_v14 = vld [vmem:[%s1547_s7 + $0x1f8] sm:$0xff]  }
  0x3e   : > { %v1430_v11 = vld [vmem:[%s1547_s7 + $0x130] sm:$0xff]   ;;  %v1434_v15 = vld [vmem:[%s1547_s7 + $0x138] sm:$0xff]  }
  0x3f   : > { %1254 = vmatpush3.bf16.msra.mxu0 %v1394_v31  ;;  %v1431_v12 = vld [vmem:[%s1547_s7 + $0x1b0] sm:$0xff]   ;;  %v1435_v16 = vld [vmem:[%s1547_s7 + $0x1b8] sm:$0xff]  }
  0x40   : > { %1276 = vmatpush3.bf16.msra.mxu1 %v1395_v32  ;;  %1255 = vmatprep.subr.bf16.mxu0 %v1396_v33  ;;  %v298_v17 = vld [vmem:[%s1549_s8 + $0x10] sm:$0xff]  ;;  %v299_v21 = vld [vmem:[%s1549_s8 + $0x18] sm:$0xff] }
  0x41   : > { %1277 = vmatprep.subr.bf16.mxu1 %v1397_v34  ;;  %v302_v18 = vld [vmem:[%s1549_s8 + $0x30] sm:$0xff]  ;;  %v303_v22 = vld [vmem:[%s1549_s8 + $0x38] sm:$0xff] }
  0x42   : > { %v1168_v19 = vcombine.low %v298_v17, %v302_v18  ;;  %v1169_v20 = vcombine.high %v298_v17, %v302_v18  ;;  %v1170_v23 = vcombine.low %v299_v21, %v303_v22  ;;  %v1171_v24 = vcombine.high %v299_v21, %v303_v22 }
  0x43   : > { %1256 = vmatpush3.bf16.msra.mxu0 %v1398_v35 }
  0x44   : > { %1278 = vmatpush3.bf16.msra.mxu1 %v1399_v36  ;;  %1257 = vmatprep.subr.bf16.mxu0 %v1400_v37 }
  0x45   : > { %1279 = vmatprep.subr.bf16.mxu1 %v1401_v38 }
  0x47   : > { %1258 = vmatpush3.bf16.msra.mxu0 %v1402_v39 }
  0x48   : > { %1280 = vmatpush3.bf16.msra.mxu1 %v1403_v40  ;;  %1287 = vmatprep.subr.bf16.mxu0 %v1404_v49 }
  0x49   : > { %1309 = vmatprep.subr.bf16.mxu1 %v1405_v50 }
  0x4a   : > { %889 = vmatmul.mubr.bf16.vlgmr.msra.gmra.mrb[0].mxu0 %v1164_v44 }
  0x4b   : > { %930 = vmatmul.mubr.bf16.vlgmr.msra.gmra.mrb[0].mxu1 %v1166_v47  ;;  %1288 = vmatpush3.bf16.msra.mxu0 %v1406_v51  ;;  %v294_v51 = vld [vmem:[%s1676_s3] sm:$0xff] }
  0x4c   : > { %1310 = vmatpush3.bf16.msra.mxu1 %v1407_v52  ;;  %1289 = vmatprep.subr.bf16.mxu0 %v1408_v53 }
  0x4d   : > { %1311 = vmatprep.subr.bf16.mxu1 %v1409_v54  ;;  %970 = vmatprep.mubr.bf16.mxu0 %v1169_v20 }
  0x4e   : > { %1011 = vmatprep.mubr.bf16.mxu1 %v1171_v24 }
  0x4f   : > { %1290 = vmatpush3.bf16.msra.mxu0 %v1410_v55  ;;  %v295_v55 = vld [vmem:[%s1676_s3 + $0x8] sm:$0xff] }
  0x50   : > { %1312 = vmatpush3.bf16.msra.mxu1 %v1411_v56  ;;  %1291 = vmatprep.subr.bf16.mxu0 %v1412_v57 }
  0x51   : > { %1313 = vmatprep.subr.bf16.mxu1 %v1413_v58 }
  0x53   : > { %1292 = vmatpush3.bf16.msra.mxu0 %v1414_v59 }
  0x54   : > { %1314 = vmatpush3.bf16.msra.mxu1 %v1415_v60  ;;  %1293 = vmatprep.subr.bf16.mxu0 %v1416_v61  ;;  %v1237_v60 = vld [vmem:[%s1675_s2] ss:$0 sm:$0xff] (!%p1236_p11) }
  0x55   : > { %1315 = vmatprep.subr.bf16.mxu1 %v1417_v62 }
  0x57   : > { %1294 = vmatpush3.bf16.msra.mxu0 %v1418_v63 }
  0x58   : > { %1316 = vmatpush3.bf16.msra.mxu1 %v1419_v0  ;;  %1295 = vmatprep.subr.bf16.mxu0 %v1420_v1 }
  0x59   : > { %1317 = vmatprep.subr.bf16.mxu1 %v1421_v2 }
  0x5b   : > { %1296 = vmatpush3.bf16.msra.mxu0 %v1422_v3 }
  0x5c   : > { %1318 = vmatpush3.bf16.msra.mxu1 %v1423_v4  ;;  %1297 = vmatprep.subr.bf16.mxu0 %v1424_v5 }
  0x5d   : > { %1319 = vmatprep.subr.bf16.mxu1 %v1425_v6 }
  0x5f   : > { %1298 = vmatpush3.bf16.msra.mxu0 %v1426_v7 }
  0x60   : > { %1320 = vmatpush3.bf16.msra.mxu1 %v1427_v8  ;;  %1299 = vmatprep.subr.bf16.mxu0 %v1428_v9 }
  0x61   : > { %1321 = vmatprep.subr.bf16.mxu1 %v1429_v10 }
  0x63   : > { %1300 = vmatpush3.bf16.msra.mxu0 %v1430_v11 }
  0x64   : > { %1322 = vmatpush3.bf16.msra.mxu1 %v1431_v12  ;;  %1301 = vmatprep.subr.bf16.mxu0 %v1432_v13 }
  0x65   : > { %1323 = vmatprep.subr.bf16.mxu1 %v1433_v14 }
  0x67   : > { %1302 = vmatpush3.bf16.msra.mxu0 %v1434_v15 }
  0x68   : > { %1324 = vmatpush3.bf16.msra.mxu1 %v1435_v16 }
  0x6a   : > { %971 = vmatmul.mubr.bf16.vlgmr.msra.gmra.mrb[4].mxu0 %v1168_v19 }
  0x6b   : > { %1012 = vmatmul.mubr.bf16.vlgmr.msra.gmra.mrb[4].mxu1 %v1170_v23 }
 0x11d   : > { %v1259_v25 = vpop.f32.mrb[0].mxu0 }
 0x11e   : > { %v1281_v26 = vpop.f32.mrb[0].mxu1  ;;  %v1260_v27 = vpop.f32.mrb[1].mxu0 }
 0x11f   : > { %v1261_v28 = vadd.f32 %v1260_v27, %v1259_v25  ;;  %v1282_v29 = vpop.f32.mrb[1].mxu1  ;;  %v1262_v30 = vpop.f32.mrb[2].mxu0 }
 0x120   : > { %v1283_v31 = vadd.f32 %v1282_v29, %v1281_v26  ;;  %v1284_v32 = vpop.f32.mrb[2].mxu1  ;;  %v1263_v33 = vpop.f32.mrb[3].mxu0 }
 0x121   : > { %v1264_v34 = vadd.f32 %v1263_v33, %v1262_v30  ;;  %v1285_v35 = vpop.f32.mrb[3].mxu1 }
 0x122   : > { %v932_v36 = vadd.f32 %v1283_v31, %v1261_v28  ;;  %v1286_v37 = vadd.f32 %v1285_v35, %v1284_v32 }
 0x124   : > { %v935_v38 = vadd.f32 %v1286_v37, %v1264_v34 }
 0x13d   : > { %v1303_v39 = vpop.f32.mrb[4].mxu0 }
 0x13e   : > { %v1325_v40 = vpop.f32.mrb[4].mxu1  ;;  %v1304_v41 = vpop.f32.mrb[5].mxu0 }
 0x13f   : > { %v1305_v42 = vadd.f32 %v1304_v41, %v1303_v39  ;;  %v1326_v43 = vpop.f32.mrb[5].mxu1  ;;  %v1306_v44 = vpop.f32.mrb[6].mxu0 }
 0x140   : > { %v1327_v45 = vadd.f32 %v1326_v43, %v1325_v40  ;;  %v1328_v46 = vpop.f32.mrb[6].mxu1  ;;  %v1307_v47 = vpop.f32.mrb[7].mxu0 }
 0x141   : > { %v973_v48 = vadd.f32 %v1305_v42, %v932_v36  ;;  %v1308_v49 = vadd.f32 %v1307_v47, %v1306_v44  ;;  %v1329_v50 = vpop.f32.mrb[7].mxu1 }
 0x142   : > { %v1330_v52 = vadd.f32 %v1329_v50, %v1328_v46 }
 0x143   : > { %v1014_v53 = vadd.f32 %v1327_v45, %v973_v48  ;;  %v976_v54 = vadd.f32 %v1308_v49, %v935_v38  ;;  %1027 = sbr.rel (%p1236_p11) target bundleno = 340 (0x154), region = 63 }
 0x145   : > { %v1020_v56 = vadd.f32 %v1014_v53, %v294_v51  ;;  %v1017_v57 = vadd.f32 %v1330_v52, %v976_v54 }
 0x147   : > { %1022 = vst [vmem:[%s1676_s3] sm:$0xff] %v1020_v56  ;;  %v1021_v58 = vadd.f32 %v1017_v57, %v295_v55 }
 0x149   : > { %1023 = vst [vmem:[%s1676_s3 + $0x8] sm:$0xff] %v1021_v58 }
 0x14e   : > { %v1028_v59 = vld [vmem:[%s1676_s3] sm:$0xff] }
 0x14f   : > { %v1037_v62 = vadd.f32 %v1237_v60, %v1028_v59 }
 0x150   : > { %v1029_v61 = vld [vmem:[%s1676_s3 + $0x8] sm:$0xff] }
 0x151   : > { %v1038_v63 = vadd.f32 %v1237_v60, %v1029_v61  ;;  %1039 = vst [vmem:[%s1676_s3] sm:$0xff] %v1037_v62 }
 0x153   : > { %1040 = vst [vmem:[%s1676_s3 + $0x8] sm:$0xff] %v1038_v63 }
 0x154 PF: > { %s13_s16 = sadd.s32 1, %s1474_s16   ;;  %s1677_s12 = smov %s1462_s13 }
 0x155   : > { %p10_p12 = scmp.ge.s32.totalorder %s13_s16, 6   ;;  %s1678_s13 = smov %s1532_s20 }
 0x156   : > { %s1679_s14 = smov %s1470_s15  ;;  %s1680_s15 = smov %s1682_s17 }
 0x157   :  { %12 = sbr.rel (!%p10_p12) target bundleno = 3 (0x3), region = 104 }

</bundles_post_ra>
